<compile_context>
chip_gen: v5e
topology: v5e:2x2
jax: 0.10.0
libtpu: 0.0.40
codegen_flags: <defaults>
</compile_context>

<pallas_src>
import jax
import jax.numpy as jnp
from jax.experimental import pallas as pl
from jax.experimental.pallas import tpu as pltpu


def _round_up(x, m):
    return (x + m - 1) // m * m


def _make_kernel(do_rate):
    """Kernel closure with the (static) dropout rate baked in."""
    keep_prob = 1.0 - float(do_rate)

    if do_rate > 0.0:
        # keep iff bits < keep_prob * 2^32  (unsigned compare, no float math)
        threshold = min(int(keep_prob * (2 ** 32)), 2 ** 32 - 1)
        inv_keep = (1.0 / keep_prob) if keep_prob > 0.0 else 0.0  # p=1.0 -> all zeros

        def kernel(x_ref, w_ref, b_ref, bits_ref, o_ref):
            # Linear: bf16 operands on the MXU, f32 accumulation.
            x = x_ref[...].astype(jnp.bfloat16)            # (tm, K)
            y = jnp.dot(x, w_ref[...],                      # (K, tn) bf16
                        preferred_element_type=jnp.float32)
            y = y + b_ref[...]                              # (1, tn) f32 broadcast
            # LeakyReLU(0.2): max(y, 0.2*y) (slope in [0,1)).
            y = jnp.maximum(y, jnp.float32(0.2) * y)
            # Inverted dropout via integer threshold on precomputed bits.
            keep = bits_ref[...] < jnp.uint32(threshold)
            y = jnp.where(keep, y * jnp.float32(inv_keep), jnp.float32(0.0))
            o_ref[...] = y.astype(o_ref.dtype)

        return kernel

    def kernel(x_ref, w_ref, b_ref, o_ref):
        x = x_ref[...].astype(jnp.bfloat16)
        y = jnp.dot(x, w_ref[...], preferred_element_type=jnp.float32)
        y = y + b_ref[...]
        y = jnp.maximum(y, jnp.float32(0.2) * y)
        o_ref[...] = y.astype(o_ref.dtype)

    return kernel


def plan_decoder_block(batch, in_dim, out_dim, vmem_budget_bytes=24 * 1024 * 1024):
    """Choose tile sizes / padded shapes against a conservative VMEM budget."""
    k_pad = _round_up(in_dim, 128)          # lanes for x, sublanes for w
    m8 = _round_up(batch, 8)
    n128 = _round_up(out_dim, 128)          # lane-dense output

    def est(tm, tn):
        # double-buffered tiles: x f32, w bf16, bias f32 (8-sublane padded),
        # dropout bits u32, output f32
        return 2 * (tm * k_pad * 4 + k_pad * tn * 2 + 8 * tn * 4 + 2 * tm * tn * 4)

    tm = 512 if m8 >= 512 else m8
    tn = 512 if n128 >= 512 else n128
    while est(tm, tn) > vmem_budget_bytes and tm >= 16 and (tm // 2) % 8 == 0:
        tm //= 2
    while est(tm, tn) > vmem_budget_bytes and tn >= 256 and (tn // 2) % 128 == 0:
        tn //= 2

    return dict(batch=batch, in_dim=in_dim, out_dim=out_dim,
                tm=tm, tn=tn,
                m_pad=_round_up(batch, tm),
                n_pad=_round_up(out_dim, tn),
                k_pad=k_pad)


def prepare_params(weight, bias, plan):
    """One-time prep (NOT in the hot path): PyTorch (out,in) weight ->
    (k_pad, n_pad) bf16 in (in_dim, out_dim) layout; bias -> (1, n_pad) f32."""
    out_dim, in_dim = weight.shape
    w_t = jnp.zeros((plan["k_pad"], plan["n_pad"]), jnp.bfloat16)
    w_t = w_t.at[:in_dim, :out_dim].set(weight.T.astype(jnp.bfloat16))
    b = jnp.zeros((1, plan["n_pad"]), jnp.float32)
    b = b.at[0, :out_dim].set(bias.astype(jnp.float32))
    return w_t, b


def decoder_block(x, w_prepared, b_prepared, plan, *, do_rate, rng_key=None):
    """x: (B, in_dim) f32.  Returns (B, out_dim) f32 = Dropout(LeakyReLU(x@W^T+b))."""
    B, in_dim = x.shape
    tm, tn = plan["tm"], plan["tn"]
    m_pad, n_pad, k_pad = plan["m_pad"], plan["n_pad"], plan["k_pad"]

    x_p = x
    if (B, in_dim) != (m_pad, k_pad):
        x_p = jnp.zeros((m_pad, k_pad), x.dtype).at[:B, :in_dim].set(x)

    in_specs = [
        pl.BlockSpec((tm, k_pad), lambda i, j: (i, 0)),   # x row tile, K resident
        pl.BlockSpec((k_pad, tn), lambda i, j: (0, j)),   # weight column tile
        pl.BlockSpec((1, tn), lambda i, j: (0, j)),       # bias: constant over M tiles
    ]
    args = [x_p, w_prepared, b_prepared]

    if do_rate > 0.0:
        if rng_key is None:
            raise ValueError("rng_key is required when do_rate > 0")
        bits = jax.random.bits(rng_key, (m_pad, n_pad), dtype=jnp.uint32)
        in_specs.append(pl.BlockSpec((tm, tn), lambda i, j: (i, j)))
        args.append(bits)

    out = pl.pallas_call(
        _make_kernel(do_rate),
        out_shape=jax.ShapeDtypeStruct((m_pad, n_pad), jnp.float32),
        grid=(m_pad // tm, n_pad // tn),
        in_specs=in_specs,
        out_specs=pl.BlockSpec((tm, tn), lambda i, j: (i, j)),
        compiler_params=pltpu.CompilerParams(
            dimension_semantics=("parallel", "parallel"),
            vmem_limit_bytes=48 * 1024 * 1024,   # below v7x's 64 MiB physical VMEM
        ),
    )(*args)

    return out[:B, :plan["out_dim"]]


if __name__ == "__main__":
    # Small shapes implied by the module: x is (batch, in_dim).
    B, in_dim, out_dim = 8, 32, 32
    do_rate = 0.1

    root = jax.random.PRNGKey(0)
    kx, kw, kb, kdrop = jax.random.split(root, 4)

    x = jax.random.normal(kx, (B, in_dim), dtype=jnp.float32)

    # nn.Linear-style deterministic init (W (out,in), b (out,)).
    bound = 1.0 / (in_dim ** 0.5)
    weight = jax.random.uniform(kw, (out_dim, in_dim),
                                minval=-bound, maxval=bound, dtype=jnp.float32)
    bias = jax.random.uniform(kb, (out_dim,),
                              minval=-bound, maxval=bound, dtype=jnp.float32)

    plan = plan_decoder_block(B, in_dim, out_dim)
    w_prep, b_prep = prepare_params(weight, bias, plan)   # one-time, off the hot path

    out = decoder_block(x, w_prep, b_prep, plan, do_rate=do_rate, rng_key=kdrop)
    out = jax.block_until_ready(out)
    assert out.shape == (B, out_dim) and out.dtype == jnp.float32

    print("KERNEL_OK")
</pallas_src>

<mosaic_0001>
module attributes {stable_mosaic.version = 11 : i64} {
  func.func @kernel(%arg0: i32, %arg1: i32, %arg2: memref<8x128xf32, #tpu.memory_space<vmem>>, %arg3: memref<128x128xbf16, #tpu.memory_space<vmem>>, %arg4: memref<1x128xf32, #tpu.memory_space<vmem>>, %arg5: memref<8x128xi32, #tpu.memory_space<vmem>>, %arg6: memref<8x128xf32, #tpu.memory_space<vmem>>) attributes {dimension_semantics = [#tpu.dimension_semantics<parallel>, #tpu.dimension_semantics<parallel>], iteration_bounds = array<i64: 1, 1>, scalar_prefetch = 0 : i64, scratch_operands = 0 : i64, tpu.core_type = #tpu.core_type<tc>, window_params = [{transform_indices = @transform_0, window_bounds = array<i64: 8, 128>}, {transform_indices = @transform_1, window_bounds = array<i64: 128, 128>}, {transform_indices = @transform_2, window_bounds = array<i64: 1, 128>}, {transform_indices = @transform_3, window_bounds = array<i64: 8, 128>}, {transform_indices = @transform_4, window_bounds = array<i64: 8, 128>}]} {
    %c0 = arith.constant 0 : index
    %c0_0 = arith.constant 0 : index
    %0 = vector.load %arg2[%c0, %c0_0] : memref<8x128xf32, #tpu.memory_space<vmem>>, vector<8x128xf32>
    %1 = arith.truncf %0 : vector<8x128xf32> to vector<8x128xbf16>
    %c0_1 = arith.constant 0 : index
    %c0_2 = arith.constant 0 : index
    %2 = vector.load %arg3[%c0_1, %c0_2] : memref<128x128xbf16, #tpu.memory_space<vmem>>, vector<128x128xbf16>
    %cst = arith.constant dense<0.000000e+00> : vector<8x128xf32>
    %3 = tpu.matmul %1, %2, %cst {dimension_numbers = #tpu.dot_dimension_numbers<[1], [0], [0], [1], [0, 0, 1, 1], [], []>} : vector<8x128xbf16>, vector<128x128xbf16>, vector<8x128xf32> -> vector<8x128xf32>
    %c0_3 = arith.constant 0 : index
    %c0_4 = arith.constant 0 : index
    %4 = vector.load %arg4[%c0_3, %c0_4] : memref<1x128xf32, #tpu.memory_space<vmem>>, vector<1x128xf32>
    %5 = vector.broadcast %4 : vector<1x128xf32> to vector<8x128xf32>
    %6 = arith.addf %3, %5 : vector<8x128xf32>
    %cst_5 = arith.constant 2.000000e-01 : f32
    %7 = vector.broadcast %cst_5 : f32 to vector<8x128xf32>
    %8 = arith.mulf %7, %6 : vector<8x128xf32>
    %9 = arith.maximumf %6, %8 : vector<8x128xf32>
    %c0_6 = arith.constant 0 : index
    %c0_7 = arith.constant 0 : index
    %10 = vector.load %arg5[%c0_6, %c0_7] : memref<8x128xi32, #tpu.memory_space<vmem>>, vector<8x128xi32>
    %c-429496730_i32 = arith.constant -429496730 : i32
    %11 = vector.broadcast %c-429496730_i32 : i32 to vector<8x128xi32>
    %12 = arith.cmpi ult, %10, %11 : vector<8x128xi32>
    %cst_8 = arith.constant 1.11111116 : f32
    %13 = vector.broadcast %cst_8 : f32 to vector<8x128xf32>
    %14 = arith.mulf %9, %13 : vector<8x128xf32>
    %cst_9 = arith.constant 0.000000e+00 : f32
    %15 = vector.broadcast %cst_9 : f32 to vector<8x128xf32>
    %16 = arith.select %12, %14, %15 : vector<8x128xi1>, vector<8x128xf32>
    %c0_10 = arith.constant 0 : index
    %c0_11 = arith.constant 0 : index
    %17 = vector.load %arg6[%c0_10, %c0_11] : memref<8x128xf32, #tpu.memory_space<vmem>>, vector<8x128xf32>
    tpu.vector_store %arg6[%c0_10, %c0_11], %16 {strides = array<i32>} : memref<8x128xf32, #tpu.memory_space<vmem>>, vector<8x128xf32>,
    return
  }
  func.func @transform_0(%arg0: i32, %arg1: i32) -> (i32, i32) {
    %c0_i32 = arith.constant 0 : i32
    %c0_i32_0 = arith.constant 0 : i32
    return %arg0, %c0_i32 : i32, i32
  }
  func.func @transform_1(%arg0: i32, %arg1: i32) -> (i32, i32) {
    %c0_i32 = arith.constant 0 : i32
    %c0_i32_0 = arith.constant 0 : i32
    return %c0_i32, %arg1 : i32, i32
  }
  func.func @transform_2(%arg0: i32, %arg1: i32) -> (i32, i32) {
    %c0_i32 = arith.constant 0 : i32
    %c0_i32_0 = arith.constant 0 : i32
    return %c0_i32, %arg1 : i32, i32
  }
  func.func @transform_3(%arg0: i32, %arg1: i32) -> (i32, i32) {
    %c0_i32 = arith.constant 0 : i32
    return %arg0, %arg1 : i32, i32
  }
  func.func @transform_4(%arg0: i32, %arg1: i32) -> (i32, i32) {
    %c0_i32 = arith.constant 0 : i32
    return %arg0, %arg1 : i32, i32
  }
}

</mosaic_0001>

<bundles_post_ra>
// kernel: tpu_custom_call.1
= control target key start
LH: loop header
LB: loop body
LE: loop exit
PB: predicated region body
PF: predicated region fallthrough
CT: control target
= control target key end

     0   :  { %9 = vsyncpa [#allocation3], 0  ;;  %s367_s0 = inlined_call_operand.hbm [shape: f32[8,128], index: 0, kind: input, shape index: {}]   ;;  %s368_s1 = inlined_call_operand.hbm [shape: bf16[128,128], index: 1, kind: input, shape index: {}]   ;;  %s369_s2 = inlined_call_operand.vmem [shape: f32[1,128], index: 2, kind: input, shape index: {}]   ;;  %s370_s3 = inlined_call_operand.hbm [shape: u32[8,128], index: 3, kind: input, shape index: {}]   ;;  %s371_s4 = inlined_call_operand.hbm [shape: f32[8,128], index: 4, kind: output, shape index: {}]  }
   0x1   :  { %10 = vsyncpa [#allocation6], 0  ;;  %s27_s17 = sshll.u32 %s368_s1, 4  ;;  %s28_s17 = int_to_ptr.hbm [resolvable:$true] %s27_s17 }
   0x2   :  { %11 = vsyncpa [#allocation4], 0  ;;  %s321_s18 = smov [#allocation5]   ;;  %s17_s22 = sshll.u32 %s367_s0, 4  ;;  %s18_s22 = int_to_ptr.hbm [resolvable:$true] %s17_s22 }
   0x3   :  { %s29_s19 = sshll.u32 %s321_s18, 4  ;;  %s322_s23 = smov 64   ;;  %s30_s19 = int_to_ptr.vmem [resolvable:$true] %s29_s19 }
   0x4   :  { %s323_s24 = smov 4   ;;  %s324_s25 = smov [#allocation2]  }
   0x5   :  { %35 = dma.hbm_to_vmem [thread:$0]  %s28_s17, 1024, %s30_s19, [#allocation6], %s322_s23, %s322_s23, %s323_s24  }
   0x6   :  { %s19_s26 = sshll.u32 %s324_s25, 4  ;;  %s43_s29 = sshll.u32 %s370_s3, 4  ;;  %s20_s26 = int_to_ptr.vmem [resolvable:$true] %s19_s26  ;;  %s44_s29 = int_to_ptr.hbm [resolvable:$true] %s43_s29 }
   0x7   :  { %22 = dma.hbm_to_vmem [thread:$0]  %s18_s22, 128, %s20_s26, [#allocation3]  }
   0x8   :  { %s325_s1 = smov [#allocation7]  }
   0x9   :  { %s45_s30 = sshll.u32 %s325_s1, 4  ;;  %s46_s30 = int_to_ptr.vmem [resolvable:$true] %s45_s30 }
   0xa   :  { %48 = dma.hbm_to_vmem [thread:$0]  %s44_s29, 128, %s46_s30, [#allocation6]  }
   0xb   :  { %315 = dma.done.wait [#allocation3], 128  }
   0xc   :  { %316 = vsyncadd [#allocation3], 4294967168 }
   0xd   :  { %317 = dma.done.wait [#allocation6], 1152  }
   0xe   :  { %318 = vsyncadd [#allocation6], 4294966144  ;;  %v211_v0 = vld [vmem:[#allocation5 + $0x38] sm:$0xff]  ;;  %v210_v1 = vld [vmem:[#allocation5 + $0x30] sm:$0xff]  ;;  %s326_s5 = smov [#allocation8]   ;;  %s160_s9 = sshll.u32 %s371_s4, 4  ;;  %s161_s9 = int_to_ptr.hbm [resolvable:$true] %s160_s9 }
   0xf   :  { %131 = vmatpush.bf16.msra.mxu0 %v211_v0  ;;  %v209_v2 = vld [vmem:[#allocation5 + $0x28] sm:$0xff]  ;;  %v208_v3 = vld [vmem:[#allocation5 + $0x20] sm:$0xff]  ;;  %v207_v4 = vld [vmem:[#allocation5 + $0x18] sm:$0xff]  ;;  %s158_s6 = sshll.u32 %s326_s5, 4  ;;  %s159_s6 = int_to_ptr.vmem [resolvable:$true] %s158_s6 }
  0x10   :  { %v206_v5 = vld [vmem:[#allocation5 + $0x10] sm:$0xff]  ;;  %v205_v6 = vld [vmem:[#allocation5 + $0x8] sm:$0xff]  ;;  %v204_v7 = vld [vmem:[#allocation5] sm:$0xff] }
  0x11   :  { %v61_v8 = vld [vmem:[#allocation2] sm:$0xff]  ;;  %v146_v11 = vld [vmem:[#allocation7] sm:$0xff] }
  0x12   :  { %v62_v9 = vpack.c.bf16 %v61_v8, %v61_v8  ;;  %v218_v10 = vld [vmem:[%s369_s2] ss:$0 sm:$0xff]  ;;  %v203_v14 = vxor.u32 2147483648, %v146_v11 }
  0x13   :  { %132 = vmatpush.bf16.msra.mxu0 %v210_v1 }
  0x14   :  { %vm149_vm0 = vcmp.lt.s32.totalorder %v203_v14, 1717986918 }
  0x17   :  { %133 = vmatpush.bf16.msra.mxu0 %v209_v2 }
  0x1b   :  { %134 = vmatpush.bf16.msra.mxu0 %v208_v3 }
  0x1f   :  { %135 = vmatpush.bf16.msra.mxu0 %v207_v4 }
  0x23   :  { %136 = vmatpush.bf16.msra.mxu0 %v206_v5 }
  0x27   :  { %137 = vmatpush.bf16.msra.mxu0 %v205_v6 }
  0x2b   :  { %138 = vmatpush.bf16.msra.mxu0 %v204_v7 }
  0x2e   :  { %139 = vmatmul.bf16.vlgmr.msra.gmra.mxu0 %v62_v9 }
  0xab   :  { %v140_v12 = vpop.f32.mrf.mxu0 }
  0xac   :  { %v141_v13 = vadd.f32 %v218_v10, %v140_v12 }
  0xae   :  { %v144_v15 = vmul.f32 0.2, %v141_v13 }
  0xb0   :  { %v145_v16 = vmax.f32 %v141_v13, %v144_v15 }
  0xb2   :  { %v150_v17 = vmul.f32 1.1111112, %v145_v16 }
  0xb3   :  { %v142_v18 = vpop.f32.mrf.mxu0 }
  0xb4   :  { %v151_v19 = vsel %vm149_vm0, %v150_v17, 0.0 }
  0xb5   :  { %152 = vst [vmem:[#allocation8] sm:$0xff] %v151_v19 }
  0xb6   :  { %163 = dma.vmem_to_hbm [thread:$0]  %s159_s6, 128, %s161_s9, [#allocation4]  }
  0xb7   :  { %319 = dma.done.wait [#allocation4], 128  }
  0xb8   :  { %320 = vsyncadd [#allocation4], 4294967168 }
  0xb9   :  { %168 = vsyncpa [#allocation3], 1 }
  0xba   :  { %169 = vsyncpa [#allocation6], 1 }
  0xbb   :  { %170 = vsyncpa [#allocation4], 1 }

</bundles_post_ra>
